<compile_context>
chip_gen: v5e
topology: v5e:2x2
jax: 0.10.0
libtpu: 0.0.40
codegen_flags: <defaults>
</compile_context>

<pallas_src>
import jax
import jax.numpy as jnp
from jax.experimental import pallas as pl
from jax.experimental.pallas import tpu as pltpu


# ----------------------------------------------------------------------------
# Pallas kernel: out = x + pos   (pos broadcast over batch rows of the block)
# ----------------------------------------------------------------------------
def _add_pos_kernel(x_ref, pos_ref, o_ref):
    o_ref[...] = x_ref[...].astype(o_ref.dtype) + pos_ref[...].astype(o_ref.dtype)


# ----------------------------------------------------------------------------
# Block sizing helpers
# ----------------------------------------------------------------------------
def _round_up(v: int, m: int) -> int:
    return -(-v // m) * m


def _padded_rows(rows: int, itemsize: int) -> int:
    # Sublane packing: 8 rows/tile f32, 16 bf16, 32 int8/fp8.
    rpt = max(1, 32 // itemsize)
    return _round_up(rows, rpt)


def _choose_chunk(L: int, B: int, x_dt, out_dt, pos_dt, *,
                  budget_bytes: int, max_chunk: int | None = None,
                  min_chunks: int = 2) -> int:
    """Lane width (chunk) of one block along the flattened S*E axis.

    chunk is a multiple of 128 that divides L, sized so the double-buffered
    (x + out + pos) footprint (with sublane padding) stays under budget_bytes,
    and such that there are >= min_chunks grid steps when possible (keeps both
    v7x TensorCores busy).  If L is not a multiple of 128, falls back to a
    single full-extent block (valid because block == full array dim).
    """
    if L % 128 != 0:
        return L
    xi = jnp.dtype(x_dt).itemsize
    oi = jnp.dtype(out_dt).itemsize
    pi = jnp.dtype(pos_dt).itemsize
    per_col = (_padded_rows(B, xi) * xi
               + _padded_rows(B, oi) * oi
               + _padded_rows(1, pi) * pi)
    chunk_max = max(128, budget_bytes // (2 * per_col))   # x2: double buffering
    if max_chunk is not None:
        chunk_max = min(chunk_max, max(128, max_chunk))
    M = L // 128
    dmax = M // min_chunks if M >= min_chunks else M
    dmax = max(1, min(dmax, chunk_max // 128))
    d = dmax
    while d > 1 and M % d != 0:
        d -= 1
    return 128 * d


# ----------------------------------------------------------------------------
# Wrapper: x [B, S, E] + pos_flat [1, P]  (P >= S*E, pre-fused 1D+2D table)
# ----------------------------------------------------------------------------
def add_positional(x: jax.Array, pos_flat: jax.Array, *,
                   vmem_budget_bytes: int = 20 << 20,
                   vmem_limit_bytes: int = 32 << 20,
                   max_chunk: int | None = None) -> jax.Array:
    B, S, E = x.shape
    L = S * E
    assert pos_flat.ndim == 2 and pos_flat.shape[0] == 1 and pos_flat.shape[1] >= L, (
        pos_flat.shape, (1, L))

    # PyTorch type promotion: bf16 activations + f32 parameters -> f32 output.
    out_dtype = jnp.promote_types(x.dtype, pos_flat.dtype)

    chunk = _choose_chunk(L, B, x.dtype, out_dtype, pos_flat.dtype,
                          budget_bytes=vmem_budget_bytes, max_chunk=max_chunk)
    lane_dense = (chunk % 128 == 0)
    if not lane_dense and pos_flat.shape[1] != L:
        # Full-extent fallback block: pos block must equal its full dims.
        # (Module callers pre-slice & cache this to avoid a per-call XLA op.)
        pos_flat = pos_flat[:, :L]
    n_c = L // chunk

    x2 = x.reshape(B, L)                     # contiguous trailing dims: free view

    isz = lambda dt: jnp.dtype(dt).itemsize
    cost = pl.CostEstimate(
        flops=B * L,
        transcendentals=0,
        bytes_accessed=B * L * (isz(x.dtype) + isz(out_dtype)) + L * isz(pos_flat.dtype),
    )

    out2 = pl.pallas_call(
        _add_pos_kernel,
        out_shape=jax.ShapeDtypeStruct((B, L), out_dtype),
        grid_spec=pltpu.PrefetchScalarGridSpec(
            num_scalar_prefetch=0,
            grid=(n_c,),
            in_specs=[
                pl.BlockSpec((B, chunk), lambda c: (0, c)),   # x (whole batch in block)
                pl.BlockSpec((1, chunk), lambda c: (0, c)),   # fused pos (broadcast over B)
            ],
            out_specs=pl.BlockSpec((B, chunk), lambda c: (0, c)),
        ),
        compiler_params=pltpu.CompilerParams(
            dimension_semantics=("parallel",),
            vmem_limit_bytes=vmem_limit_bytes),
        cost_estimate=cost,
        # input_output_aliases={0: 0} would be possible when x.dtype == out_dtype
        # and callers donate x; intentionally not enabled by default.
    )(x2, pos_flat)

    return out2.reshape(B, S, E)


# ----------------------------------------------------------------------------
# Module port (parameter setup + static table assembly done ONCE at init)
# ----------------------------------------------------------------------------
class LearnedPositionalEncodingCombined:
    def __init__(self, emb_size: int, num_patches_x: int = 5, num_patches_y: int = 5,
                 num_support: int = 18, *, key: jax.Array):
        self.emb_size = emb_size
        self.num_patches_x = num_patches_x
        self.num_patches_y = num_patches_y
        self.grid_block_size = num_patches_x * num_patches_y
        self.num_support = num_support
        self.max_seq_len = num_support * (2 * self.grid_block_size + 2) + self.grid_block_size + 1
        self.target_seq_len = 1 + self.grid_block_size

        k1, k2, k3 = jax.random.split(key, 3)
        # nn.Parameter(torch.randn(...)) equivalents (kept in f32 like PyTorch).
        self.pos_embedding = jax.random.normal(k1, (1, self.max_seq_len, emb_size), jnp.float32)
        self.row_embed = jax.random.normal(k2, (num_patches_x, emb_size), jnp.float32)
        self.col_embed = jax.random.normal(k3, (num_patches_y, emb_size), jnp.float32)

        self.grid_boundaries = self._compute_grid_boundaries()
        self.rebuild_tables()

    # TODO(synk): the fused tables are a snapshot of the parameters (eval-mode
    # forward only).  For training, call rebuild_tables() after each parameter
    # update, or keep the unfused forward_ref path for differentiation.
    def rebuild_tables(self):
        pos_comb = self.pos_embedding + self._compute_pos_encoding()                 # [1, maxS, E]
        pos_comb_t = (self.pos_embedding[:, :self.target_seq_len, :]
                      + self._compute_pos_encoding_target())                         # [1, T, E]
        self._pos_flat = pos_comb.reshape(1, -1)
        self._pos_flat_target = pos_comb_t.reshape(1, -1)
        self._pos_cache = {}                                                         # (target, seq_len) -> array

    def _compute_grid_boundaries(self):
        boundaries = []
        idx = 0
        for _ in range(self.num_support):
            boundaries.append((idx, idx + self.grid_block_size))
            idx += self.grid_block_size + 1
            boundaries.append((idx, idx + self.grid_block_size))
            idx += self.grid_block_size + 1
        boundaries.append((idx, idx + self.grid_block_size))
        return boundaries

    def _grid_encoding(self) -> jax.Array:
        # row-major flattening: block[i*Py + j] = row_embed[i] + col_embed[j]
        enc = self.row_embed[:, None, :] + self.col_embed[None, :, :]
        return enc.reshape(self.grid_block_size, self.emb_size)

    def _compute_pos_encoding(self) -> jax.Array:
        grid_encoding = self._grid_encoding()
        table = jnp.zeros((self.max_seq_len, self.emb_size), jnp.float32)
        for start, end in self.grid_boundaries:   # static python loop, init-time only
            table = table.at[start:end].set(grid_encoding)
        return table[None]                        # [1, max_seq_len, E]

    def _compute_pos_encoding_target(self) -> jax.Array:
        grid_encoding = self._grid_encoding()
        table = jnp.zeros((self.target_seq_len, self.emb_size), jnp.float32)
        table = table.at[1:].set(grid_encoding)   # SOS token gets no 2D offset
        return table[None]                        # [1, target_seq_len, E]

    def _pos_for(self, seq_len: int, target: bool) -> jax.Array:
        """Cached table to hand to the kernel (no per-call slice/astype ops).

        The PyTorch module builds the full max_seq_len 2D table from boundaries
        computed on max_seq_len and then prefix-slices it, so a prefix slice of
        the fused table is exactly equivalent."""
        key = (bool(target), int(seq_len))
        pos = self._pos_cache.get(key)
        if pos is None:
            full = self._pos_flat_target if target else self._pos_flat
            L = seq_len * self.emb_size
            assert L <= full.shape[1], (seq_len, "exceeds table length")
            pos = full if (L % 128 == 0) else full[:, :L]   # lane-dense path: no slice at all
            self._pos_cache[key] = pos
        return pos

    def forward(self, x: jax.Array, target: bool = False) -> jax.Array:
        """x: [B, S, E] -> [B, S, E] (f32 if x is lower precision, matching torch promotion)."""
        # TODO(synk): training-mode dropout (random mask) not reproduced; eval mode is identity.
        _, seq_len, E = x.shape
        assert E == self.emb_size
        return add_positional(x, self._pos_for(seq_len, target))

    # pure-JAX reference (unfused, mirrors the PyTorch forward) for validation
    def forward_ref(self, x: jax.Array, target: bool = False) -> jax.Array:
        seq_len = x.shape[1]
        pos1d = self.pos_embedding[:, :seq_len, :]
        pos2d = (self._compute_pos_encoding_target() if target
                 else self._compute_pos_encoding())[:, :seq_len, :]
        return x + pos1d + pos2d   # jnp promotion matches torch (bf16 + f32 -> f32)


if __name__ == "__main__":
    key = jax.random.PRNGKey(0)
    k_mod, k_x, k_t, k_b, k_big, k_pos = jax.random.split(key, 6)

    # Small config: Px=Py=2 -> grid_block_size=4, num_support=2 -> max_seq_len=25,
    # target_seq_len=5, emb=32, batch=2.
    emb_size = 32
    module = LearnedPositionalEncodingCombined(
        emb_size, num_patches_x=2, num_patches_y=2, num_support=2, key=k_mod)

    # 1) Non-target path, f32: seq_len=16 -> flattened length 512 (lane-dense path, 2 chunks)
    x = jax.random.normal(k_x, (2, 16, emb_size), jnp.float32)
    out = jax.block_until_ready(module.forward(x, target=False))
    ref = module.forward_ref(x, target=False)
    assert out.shape == x.shape and out.dtype == x.dtype
    assert jnp.allclose(out, ref, atol=1e-5, rtol=1e-5)

    # 2) Target path, f32: seq_len=5 -> flattened length 160 (full-extent fallback block)
    xt = jax.random.normal(k_t, (2, 5, emb_size), jnp.float32)
    out_t = jax.block_until_ready(module.forward(xt, target=True))
    ref_t = module.forward_ref(xt, target=True)
    assert jnp.allclose(out_t, ref_t, atol=1e-5, rtol=1e-5)

    # 3) bf16 activations: PyTorch promotion -> f32 output, add performed in f32
    xb = jax.random.normal(k_b, (2, 24, emb_size), jnp.float32).astype(jnp.bfloat16)
    out_b = jax.block_until_ready(module.forward(xb, target=False))
    ref_b = module.forward_ref(xb, target=False)
    assert out_b.dtype == jnp.float32
    assert jnp.allclose(out_b, ref_b, atol=1e-5, rtol=1e-5)

    # 4) Multi-chunk tiled path exercised directly (S*E=32768 split into 4096-lane chunks)
    Bt, St, Et = 2, 256, 128
    xl = jax.random.normal(k_big, (Bt, St, Et), jnp.float32)
    pos_l = jax.random.normal(k_pos, (1, St * Et), jnp.float32)
    out_l = jax.block_until_ready(add_positional(xl, pos_l, max_chunk=4096))
    assert jnp.allclose(out_l, xl + pos_l.reshape(1, St, Et), atol=1e-6, rtol=1e-6)

    print("KERNEL_OK")
</pallas_src>

<mosaic_0001>
module attributes {stable_mosaic.version = 11 : i64} {
  func.func @_add_pos_kernel(%arg0: i32, %arg1: memref<2x256xf32, #tpu.memory_space<vmem>>, %arg2: memref<1x256xf32, #tpu.memory_space<vmem>>, %arg3: memref<2x256xf32, #tpu.memory_space<vmem>>) attributes {dimension_semantics = [#tpu.dimension_semantics<parallel>], iteration_bounds = array<i64: 2>, scalar_prefetch = 0 : i64, scratch_operands = 0 : i64, tpu.core_type = #tpu.core_type<tc>, window_params = [{transform_indices = @transform_0, window_bounds = array<i64: 2, 256>}, {transform_indices = @transform_1, window_bounds = array<i64: 1, 256>}, {transform_indices = @transform_2, window_bounds = array<i64: 2, 256>}]} {
    %c0 = arith.constant 0 : index
    %c0_0 = arith.constant 0 : index
    %0 = vector.load %arg1[%c0, %c0_0] : memref<2x256xf32, #tpu.memory_space<vmem>>, vector<2x256xf32>
    %c0_1 = arith.constant 0 : index
    %c0_2 = arith.constant 0 : index
    %1 = vector.load %arg2[%c0_1, %c0_2] : memref<1x256xf32, #tpu.memory_space<vmem>>, vector<1x256xf32>
    %2 = vector.broadcast %1 : vector<1x256xf32> to vector<2x256xf32>
    %3 = arith.addf %0, %2 : vector<2x256xf32>
    %c0_3 = arith.constant 0 : index
    %c0_4 = arith.constant 0 : index
    %4 = vector.load %arg3[%c0_3, %c0_4] : memref<2x256xf32, #tpu.memory_space<vmem>>, vector<2x256xf32>
    tpu.vector_store %arg3[%c0_3, %c0_4], %3 {strides = array<i32>} : memref<2x256xf32, #tpu.memory_space<vmem>>, vector<2x256xf32>,
    return
  }
  func.func @transform_0(%arg0: i32) -> (i32, i32) {
    %c0_i32 = arith.constant 0 : i32
    %c0_i32_0 = arith.constant 0 : i32
    return %c0_i32, %arg0 : i32, i32
  }
  func.func @transform_1(%arg0: i32) -> (i32, i32) {
    %c0_i32 = arith.constant 0 : i32
    %c0_i32_0 = arith.constant 0 : i32
    return %c0_i32, %arg0 : i32, i32
  }
  func.func @transform_2(%arg0: i32) -> (i32, i32) {
    %c0_i32 = arith.constant 0 : i32
    %c0_i32_0 = arith.constant 0 : i32
    return %c0_i32, %arg0 : i32, i32
  }
}

</mosaic_0001>

<bundles_post_ra>
// kernel: tpu_custom_call.1
= control target key start
LH: loop header
LB: loop body
LE: loop exit
PB: predicated region body
PF: predicated region fallthrough
CT: control target
= control target key end

     0   :  { %7 = vsyncpa [#allocation3], 0  ;;  %s715_s0 = inlined_call_operand.hbm [shape: f32[2,512], index: 0, kind: input, shape index: {}]   ;;  %s716_s1 = inlined_call_operand.hbm [shape: f32[1,800], index: 1, kind: input, shape index: {}]   ;;  %s717_s2 = inlined_call_operand.hbm [shape: f32[2,512], index: 2, kind: output, shape index: {}]  }
   0x1   :  { %9 = vsyncpa [#allocation3 + $0x1], 0 }
   0x2   :  { %10 = vsyncpa [#allocation6], 0 }
   0x3   :  { %12 = vsyncpa [#allocation6 + $0x1], 0 }
   0x4   :  { %13 = vsyncpa [#allocation4], 0 }
   0x5   :  { %15 = vsyncpa [#allocation4 + $0x1], 0  ;;  %s550_s9 = smov 0   ;;  %s552_s10 = smov 0  }
   0x6   :  { %s554_s11 = smov 0   ;;  %s556_s12 = smov 0  }
   0x7 LB: > { %s571_s13 = sadd.s32 4294967295, %s532_s12   ;;  %s333_s14 = sadd.s32 4294967294, %s532_s12   ;;  %s532_s12 = sphi %s556_s12, %s727_s12   ;;  %s528_s11 = sphi %s554_s11, %s726_s11   ;;  %s524_s10 = sphi %s552_s10, %s725_s10   ;;  %s520_s9 = sphi %s550_s9, %s724_s9  }
   0x8   : > { %s575_s15 = sadd.s32 1, %s532_s12   ;;  %s28_s16 = sadd.s32 1, %s528_s11 }
   0x9   : > { %s25_s17 = ssub.s32 %s532_s12, %s575_s15  ;;  %p35_p0 = scmp.ne.s32.totalorder %s528_s11, %s524_s10 }
   0xa   : > { %p26_p1 = scmp.eq.s32.totalorder %s25_s17, 0  ;;  %p36_p2 = scmp.eq.s32.totalorder %s532_s12, 0 }
   0xb   : > { %p41_p3 = scmp.ne.s32.totalorder %s524_s10, %s520_s9  ;;  %p42_p4 = scmp.eq.s32.totalorder %s571_s13, 0 }
   0xc   : > { %s587_s18 = scalar_select %p26_p1, %s528_s11, %s28_s16  }
   0xd   : > { %p589_p5 = por %p36_p2, %p35_p0  ;;  %p593_p6 = por %p42_p4, %p41_p3 }
   0xe   : > { %p91_p7 = scmp.eq.s32.totalorder %s571_s13, 1  ;;  %p97_p8 = scmp.eq.s32.totalorder %s333_s14, 1 }
   0xf   : > { %p718_p11 = scmp.ge.s32.totalorder %s532_s12, 2 }
  0x10   : > { %p598_p9 = por %p91_p7, %p35_p0  ;;  %p602_p10 = por %p97_p8, %p41_p3 }
  0x11   : > { %113 = sbr.rel (%p718_p11) target bundleno = 67 (0x43), region = 16  ;;  %s610_s23 = sand.u32 (!%p718_p11), 1, %s528_s11  }
  0x12   : > { %s351_s24 = sshll.u32 (!%p718_p11), %s532_s12, 2  ;;  %s336_s25 = sshll.u32 (!%p718_p11), %s610_s23, 2 }
  0x13   : > { %s126_s28 = scalar_lea.hbm (!%p718_p11), %s715_s0, %s351_s24  ;;  %s121_s30 = scalar_lea.vmem (!%p718_p11), [#allocation2], %s336_s25 }
  0x14   : > { %s128_s29 = sshll.u32 (!%p718_p11), %s126_s28, 4  ;;  %s130_s3 = sshll.u32 (!%p718_p11), %s121_s30, 4  ;;  %s129_s29 = int_to_ptr.hbm [resolvable:$true] %s128_s29  ;;  %s131_s3 = int_to_ptr.vmem [resolvable:$true] %s130_s3 }
  0x15   : > { %s118_s4 = scalar_lea.sflag (!%p718_p11), [#allocation3], %s610_s23  ;;  %s395_s5 = sshra.s32 (!%p718_p11), %s129_s29, 4  ;;  %s396_s5 = int_to_ptr.hbm [resolvable:$true] %s395_s5 }
  0x16   : > { %s397_s6 = scalar_lea.hbm %s396_s5, 4  ;;  %s401_s14 = scalar_lea.hbm %s715_s0, 8 }
  0x17   : > { %p398_p12 = scmp.ne.s32.totalorder %s396_s5, %s397_s6  ;;  %p402_p1 = scmp.lt.s32.totalorder %s396_s5, %s715_s0 }
  0x18   : > { %p403_p2 = scmp.lt.s32.totalorder %s401_s14, %s397_s6 }
  0x19   : > { %p399_p13 = pnand %p398_p12, %p589_p5 }
  0x1a   : > { %p404_p3 = por %p403_p2, %p402_p1 }
  0x1b   : > { %p400_p0 = pneg %p399_p13 }
  0x1d   : > { %p405_p4 = pnand %p404_p3, %p400_p0 }
  0x1f   : > { %408 = shalt.err (!%p405_p4)
}
  0x20   : > { %353 = dma.hbm_to_vmem [thread:$0]  (%p589_p5), %s129_s29, 64, %s131_s3, %s118_s4  }
  0x21   : > { %136 = sbr.rel (!%p589_p5) target bundleno = 67 (0x43), region = 24  ;;  %s339_s24 = sshll.u32 (%p589_p5), %s610_s23, 1 }
  0x22   : > { %s340_s25 = sshll.u32 (%p589_p5), %s532_s12, 1  ;;  %s138_s30 = scalar_lea.sflag (%p589_p5), [#allocation6], %s610_s23 }
  0x23   : > { %s143_s26 = ssub.s32 (%p589_p5), 7, %s340_s25  ;;  %s141_s5 = scalar_lea.vmem (%p589_p5), [#allocation5], %s339_s24 }
  0x24   : > { %p144_p7 = scmp.lt.s32.totalorder (%p589_p5), %s143_s26, 2 }
  0x26   : > { %s729_s26 = smov (!%p144_p7, %s143_s26), 2 }
  0x27   : > { %s146_s27 = ssub.s32 2, %s729_s26 }
  0x28   : > { %s147_s28 = sshll.u32 %s146_s27, 4 }
  0x29   : > { %148 = vsyncadd %s138_s30, %s147_s28  ;;  %p341_p5 = scmp.ne.s32.totalorder %s729_s26, 0  ;;  %s150_s3 = scalar_lea.hbm %s716_s1, %s340_s25 }
  0x2a   : > { %s151_s4 = sshll.u32 %s729_s26, 4  ;;  %s152_s6 = sshll.u32 %s150_s3, 4  ;;  %s643_s6 = int_to_ptr.hbm [resolvable:$true] %s152_s6 }
  0x2b   : > { %s154_s7 = sshll.u32 %s141_s5, 4  ;;  %s423_s8 = sshra.s32 %s643_s6, 4  ;;  %s155_s7 = int_to_ptr.vmem [resolvable:$true] %s154_s7  ;;  %s424_s8 = int_to_ptr.hbm [resolvable:$true] %s423_s8 }
  0x2c   : > { %s425_s14 = sshrl.u32 %s151_s4, 4  ;;  %s434_s25 = scalar_lea.hbm %s716_s1, 7 }
  0x2d   : > { %s430_s16 = scalar_lea.hbm %s424_s8, %s425_s14  ;;  %p435_p0 = scmp.lt.s32.totalorder %s424_s8, %s716_s1 }
  0x2e   : > { %p431_p8 = scmp.ne.s32.totalorder %s424_s8, %s430_s16  ;;  %p436_p1 = scmp.lt.s32.totalorder %s434_s25, %s430_s16 }
  0x30   : > { %p432_p12 = pnand %p431_p8, %p341_p5  ;;  %p437_p2 = por %p436_p1, %p435_p0 }
  0x32   : > { %p433_p13 = pneg %p432_p12 }
  0x34   : > { %p438_p3 = pnand %p437_p2, %p433_p13 }
  0x36   : > { %441 = shalt.err (!%p438_p3)
}
  0x37   : > { %s442_s5 = sshra.s32 %s155_s7, 4  ;;  %s534_s29 = smov [#allocation5]   ;;  %s443_s5 = int_to_ptr.vmem [resolvable:$true] %s442_s5 }
  0x38   : > { %s449_s19 = scalar_lea.vmem %s443_s5, %s425_s14  ;;  %s453_s3 = scalar_lea.vmem %s534_s29, 4 }
  0x39   : > { %p450_p4 = scmp.ne.s32.totalorder %s443_s5, %s449_s19  ;;  %p455_p12 = scmp.lt.s32.totalorder %s453_s3, %s449_s19 }
  0x3b   : > { %p451_p7 = pnand %p450_p4, %p341_p5 }
  0x3d   : > { %p452_p8 = pneg %p451_p7 }
  0x3f   : > { %p457_p11 = pnand %p455_p12, %p452_p8 }
  0x41   : > { %460 = shalt.err (!%p457_p11)
}
  0x42   : > { %157 = dma.hbm_to_vmem [thread:$0]  (%p341_p5), %s643_s6, %s151_s4, %s155_s7, %s138_s30  }
  0x43 PF: > { %p342_p13 = scmp.ge.s32.totalorder %s532_s12, 1  ;;  %p159_p0 = scmp.lt.s32.totalorder %s532_s12, 3 }
  0x45   : > { %p160_p1 = pnand %p342_p13, %p159_p0 }
  0x46   : > { %s668_s8 = sand.u32 (!%p160_p1), 1, %s524_s10  }
  0x47   : > { %163 = sbr.rel (%p160_p1) target bundleno = 95 (0x5f), region = 28  ;;  %s343_s14 = sshll.u32 (!%p160_p1), %s668_s8, 2 }
  0x48   : > { %s166_s23 = scalar_lea.sflag (!%p160_p1), [#allocation3], %s668_s8  ;;  %s169_s16 = scalar_lea.vmem (!%p160_p1), [#allocation2], %s343_s14 }
  0x4c   : > { %507 = dma.done.wait (%p593_p6), %s166_s23, 64  }
  0x4d   : > { %509 = vsyncadd (%p593_p6), %s166_s23, 4294967232  ;;  %s344_s26 = sshll.u32 %s668_s8, 1  ;;  %s176_s30 = scalar_lea.sflag [#allocation6], %s668_s8 }
  0x4e   : > { %s179_s4 = scalar_lea.vmem [#allocation5], %s344_s26 }
  0x4f   : > { %511 = dma.done.wait (%p593_p6), %s176_s30, 32  }
  0x50   : > { %513 = vsyncadd (%p593_p6), %s176_s30, 4294967264  ;;  %s352_s6 = sshll.u32 %s571_s13, 2  ;;  %v213_v0 = vld [vmem:[%s179_s4] sm:$0x3]  ;;  %vm218_vm0 = vcmask 1041408   ;;  %s205_s25 = scalar_lea.vmem [#allocation7], %s343_s14 }
  0x51   : > { %s235_s24 = scalar_lea.hbm %s717_s2, %s352_s6  ;;  %v215_v1 = vperm.slane %v213_v0, 0  ;;  %v216_v2 = vperm.slane %v213_v0, 1  ;;  %v212_v3 = vld [vmem:[%s169_s16] sm:$0xf]  ;;  %s237_s27 = sshll.u32 %s205_s25, 4  ;;  %s238_s27 = int_to_ptr.vmem [resolvable:$true] %s237_s27 }
  0x52   : > { %s239_s28 = sshll.u32 %s235_s24, 4  ;;  %s224_s13 = scalar_lea.sflag [#allocation4], %s668_s8  ;;  %s240_s28 = int_to_ptr.hbm [resolvable:$true] %s239_s28 }
  0x53   : > { %v217_v4 = vrot.slane %v216_v2, 6  ;;  %s476_s20 = sshra.s32 %s240_s28, 4  ;;  %s482_s3 = scalar_lea.hbm %s717_s2, 8  ;;  %s477_s20 = int_to_ptr.hbm [resolvable:$true] %s476_s20 }
  0x54   : > { %s478_s5 = scalar_lea.hbm %s477_s20, 4  ;;  %p483_p2 = scmp.lt.s32.totalorder %s477_s20, %s717_s2 }
  0x55   : > { %v219_v5 = vsel %vm218_vm0, %v215_v1, %v217_v4  ;;  %p479_p6 = scmp.ne.s32.totalorder %s477_s20, %s478_s5  ;;  %p484_p3 = scmp.lt.s32.totalorder %s482_s3, %s478_s5 }
  0x56   : > { %v221_v6 = vadd.f32 %v219_v5, %v212_v3 }
  0x57   : > { %p480_p11 = pnand %p479_p6, %p598_p9  ;;  %p485_p4 = por %p484_p3, %p483_p2 }
  0x58   : > { %222 = vst [vmem:[%s205_s25] sm:$0xf] %v221_v6 }
  0x59   : > { %p481_p5 = pneg %p480_p11 }
  0x5b   : > { %p486_p7 = pnand %p485_p4, %p481_p5 }
  0x5d   : > { %489 = shalt.err (!%p486_p7)
}
  0x5e   : > { %356 = dma.vmem_to_hbm [thread:$0]  (%p598_p9), %s238_s27, 64, %s240_s28, %s224_s13  }
  0x5f PF: > { %s251_s8 = sand.u32 1, %s520_s9   ;;  %p723_p8 = scmp.ge.s32.totalorder %s532_s12, 2 }
  0x60   : > { %s252_s16 = scalar_lea.sflag [#allocation4], %s251_s8 }
  0x61   : > { %p359_p12 = pnand %p723_p8, %p602_p10 }
  0x63   : > { %p360_p13 = pneg %p359_p12 }
  0x65   : > { %515 = dma.done.wait (%p360_p13), %s252_s16, 64  }
  0x66   : > { %517 = vsyncadd (%p360_p13), %s252_s16, 4294967232  ;;  %p18_p0 = scmp.ge.s32.totalorder %s575_s15, 4   ;;  %s724_s9 = smov %s524_s10 }
  0x67   : > { %s725_s10 = smov %s528_s11  ;;  %s726_s11 = smov %s587_s18 }
  0x68   : > { %s727_s12 = smov %s575_s15  ;;  %20 = sbr.rel (!%p18_p0) target bundleno = 7 (0x7), region = 86 }
  0x6d   :  { %258 = vsyncpa [#allocation3], 1 }
  0x6e   :  { %260 = vsyncpa [#allocation3 + $0x1], 1 }
  0x6f   :  { %261 = vsyncpa [#allocation6], 1 }
  0x70   :  { %263 = vsyncpa [#allocation6 + $0x1], 1 }
  0x71   :  { %264 = vsyncpa [#allocation4], 1 }
  0x72   :  { %266 = vsyncpa [#allocation4 + $0x1], 1 }

</bundles_post_ra>
